<compile_context>
chip_gen: v6e
topology: v6e:2x2x1
jax: 0.10.0
libtpu: 0.0.40
codegen_flags: <defaults>
</compile_context>

<pallas_src>
import jax
import jax.numpy as jnp
from jax import lax
from jax.experimental import pallas as pl
from jax.experimental.pallas import tpu as pltpu


def _proto_layer_kernel(comm_ref, proto_ref, psq_ref, d2p_ref, d2c_ref):
    """One batch tile of comm <-> prototype squared-L2 distances.

    comm_ref : (tn, D) f32  tile of comm vectors
    proto_ref: (P, D)  f32  sigmoid-constrained prototypes
    psq_ref  : (1, P)  f32  ||p_j||^2 row
    d2p_ref  : (tn, P) f32  distances comm -> prototype
    d2c_ref  : (P, tn) f32  distances prototype -> comm  (== d2p^T)
    """
    c = comm_ref[...]                                     # (tn, D)
    p = proto_ref[...]                                    # (P, D)
    p_sq = psq_ref[...]                                   # (1, P)

    c_sq = jnp.sum(c * c, axis=1, keepdims=True)          # (tn, 1), exact f32

    # Single NT contraction; norm terms stay on the VPU (exact f32 epilogue).
    cross = lax.dot_general(
        c, p,
        dimension_numbers=(((1,), (1,)), ((), ())),       # c @ p^T
        precision=lax.Precision.HIGHEST,
        preferred_element_type=jnp.float32)                # (tn, P)

    d2p = c_sq + p_sq - 2.0 * cross                        # (tn, P)
    d2p_ref[...] = d2p
    # d2c is exactly the transpose: no second matmul; the XLU transpose feeds
    # a lane-dense (P, tn) store (tn % 128 == 0 -> unmasked vst).
    d2c_ref[...] = jnp.transpose(d2p)


def _round_up(x, m):
    return ((x + m - 1) // m) * m


def _pick_tiling(n, d, p):
    """Choose (tile_n, padded_n) for the batch axis.

    Targets an ~8 MiB double-buffered working set (comm tile + both output
    tiles, x2 buffers) so it fits every generation's scoped-VMEM budget,
    keeps tiles lane-aligned (multiples of 128), guarantees >= 2 grid steps
    when N allows (so both v7x TensorCores get work), and prefers exact
    divisors of N to avoid padding.
    """
    lane = 128
    vmem_budget = 8 * 1024 * 1024
    per_row = 2 * (d + 2 * p) * 4           # double-buffered bytes per comm row
    cap = max(lane, min(8192, (vmem_budget // per_row) // lane * lane))

    n128 = _round_up(max(n, 1), lane)
    if n128 <= lane:
        return lane, lane                    # single 128-row tile, grid=(1,)

    steps = max(2, pl.cdiv(n128, cap))       # >= 2 steps for v7x megacore
    tn = _round_up(pl.cdiv(n128, steps), lane)
    tn = max(lane, min(tn, cap))

    if n128 % tn != 0:
        # Prefer an exact multiple-of-128 divisor (no padding) as long as it
        # does not shrink the tile by more than 2x.
        for cand in range(tn, max(lane, tn // 2) - 1, -lane):
            if n128 % cand == 0:
                return cand, n128
    return tn, _round_up(n128, tn)


def proto_layer_forward(comm_vectors, prototypes):
    """Pallas ProtoLayer forward.

    Returns (dists_to_protos (N, P), dists_to_comms (P, N)).
    """
    comm_vectors = jnp.asarray(comm_vectors, jnp.float32)
    prototypes = jnp.asarray(prototypes, jnp.float32)
    n, d = comm_vectors.shape
    p, d2 = prototypes.shape
    assert d == d2, "comm_dim mismatch"

    # Grid-invariant prototype prep, hoisted out of the per-tile body
    # (tiny (P, D) one-shot work; saves per-step EUP sigmoid + XLU reduce).
    constrained = jax.nn.sigmoid(prototypes)                          # (P, D)
    p_sq_row = jnp.sum(constrained * constrained, axis=1)[None, :]    # (1, P)

    tn, n_pad = _pick_tiling(n, d, p)
    comm_in = comm_vectors
    if n_pad != n:
        comm_in = jnp.pad(comm_vectors, ((0, n_pad - n), (0, 0)))

    d2p, d2c = pl.pallas_call(
        _proto_layer_kernel,
        out_shape=(
            jax.ShapeDtypeStruct((n_pad, p), jnp.float32),
            jax.ShapeDtypeStruct((p, n_pad), jnp.float32),
        ),
        grid=(n_pad // tn,),
        in_specs=[
            pl.BlockSpec((tn, d), lambda i: (i, 0)),    # comm tile
            pl.BlockSpec((p, d), lambda i: (0, 0)),     # constrained protos
            pl.BlockSpec((1, p), lambda i: (0, 0)),     # ||p||^2 row
        ],
        out_specs=(
            pl.BlockSpec((tn, p), lambda i: (i, 0)),    # dists_to_protos
            pl.BlockSpec((p, tn), lambda i: (0, i)),    # dists_to_comms
        ),
        compiler_params=pltpu.CompilerParams(
            dimension_semantics=("parallel",),           # v7x megacore split
            vmem_limit_bytes=32 * 1024 * 1024,
        ),
    )(comm_in, constrained, p_sq_row)

    if n_pad != n:
        d2p = d2p[:n]
        d2c = d2c[:, :n]
    return d2p, d2c


def make_prototypes(num_prototypes, comm_dim):
    """Deterministic init matching ProtoLayer.__init__ (5 on the diagonal,
    -5 elsewhere)."""
    base = jnp.full((num_prototypes, comm_dim), -5.0, dtype=jnp.float32)
    return base + 10.0 * jnp.eye(num_prototypes, comm_dim, dtype=jnp.float32)


def reference_forward(comm_vectors, prototypes):
    """Pure-JAX reference of the PyTorch forward (same matmul precision)."""
    cp = jax.nn.sigmoid(prototypes)
    c_sq = jnp.sum(comm_vectors ** 2, axis=1)
    p_sq = jnp.sum(cp ** 2, axis=1)
    hi = lax.Precision.HIGHEST
    d2p = (c_sq[:, None] + p_sq[None, :]
           - 2.0 * jnp.matmul(comm_vectors, cp.T, precision=hi))
    d2c = (c_sq[None, :] + p_sq[:, None]
           - 2.0 * jnp.matmul(cp, comm_vectors.T, precision=hi))
    return d2p, d2c


if __name__ == "__main__":
    comm_dim = 32
    num_prototypes = 16
    prototypes = make_prototypes(num_prototypes, comm_dim)
    key = jax.random.PRNGKey(0)

    # small: single padded tile; tiled: 3-step grid; ragged: padded last tile.
    cases = (("small", 8, 0), ("tiled", 384, 1), ("ragged", 200, 2))
    for name, batch, fold in cases:
        comm = jax.random.normal(jax.random.fold_in(key, fold),
                                 (batch, comm_dim), dtype=jnp.float32)
        d2p, d2c = proto_layer_forward(comm, prototypes)
        jax.block_until_ready((d2p, d2c))
        r2p, r2c = reference_forward(comm, prototypes)
        assert d2p.shape == (batch, num_prototypes), name
        assert d2c.shape == (num_prototypes, batch), name
        assert jnp.allclose(d2p, r2p, atol=1e-3, rtol=1e-3), name
        assert jnp.allclose(d2c, r2c, atol=1e-3, rtol=1e-3), name

    print("KERNEL_OK")
</pallas_src>

<mosaic_0001>
module attributes {stable_mosaic.version = 11 : i64} {
  func.func @_proto_layer_kernel(%arg0: i32, %arg1: memref<128x32xf32, #tpu.memory_space<vmem>>, %arg2: memref<16x32xf32, #tpu.memory_space<vmem>>, %arg3: memref<1x16xf32, #tpu.memory_space<vmem>>, %arg4: memref<128x16xf32, #tpu.memory_space<vmem>>, %arg5: memref<16x128xf32, #tpu.memory_space<vmem>>) attributes {dimension_semantics = [#tpu.dimension_semantics<parallel>], iteration_bounds = array<i64: 1>, scalar_prefetch = 0 : i64, scratch_operands = 0 : i64, tpu.core_type = #tpu.core_type<tc>, window_params = [{transform_indices = @transform_0, window_bounds = array<i64: 128, 32>}, {pipeline_mode = #tpu.pipeline_mode<synchronous>, transform_indices = @transform_1, window_bounds = array<i64: 16, 32>}, {pipeline_mode = #tpu.pipeline_mode<synchronous>, transform_indices = @transform_2, window_bounds = array<i64: 1, 16>}, {transform_indices = @transform_3, window_bounds = array<i64: 128, 16>}, {transform_indices = @transform_4, window_bounds = array<i64: 16, 128>}]} {
    %c0 = arith.constant 0 : index
    %c0_0 = arith.constant 0 : index
    %0 = vector.load %arg1[%c0, %c0_0] : memref<128x32xf32, #tpu.memory_space<vmem>>, vector<128x32xf32>
    %c0_1 = arith.constant 0 : index
    %c0_2 = arith.constant 0 : index
    %1 = vector.load %arg2[%c0_1, %c0_2] : memref<16x32xf32, #tpu.memory_space<vmem>>, vector<16x32xf32>
    %c0_3 = arith.constant 0 : index
    %c0_4 = arith.constant 0 : index
    %2 = vector.load %arg3[%c0_3, %c0_4] : memref<1x16xf32, #tpu.memory_space<vmem>>, vector<1x16xf32>
    %3 = arith.mulf %0, %0 : vector<128x32xf32>
    %cst = arith.constant dense<0.000000e+00> : vector<128xf32>
    %4 = vector.multi_reduction <add>, %3, %cst [1] : vector<128x32xf32> to vector<128xf32>
    %5 = vector.shape_cast %4 : vector<128xf32> to vector<128x1xf32>
    %cst_5 = arith.constant dense<0.000000e+00> : vector<128x16xf32>
    %6 = tpu.matmul %0, %1, %cst_5 {dimension_numbers = #tpu.dot_dimension_numbers<[1], [1], [0], [0], [0, 0, 1, 0], [], []>, precision = #tpu.contract_precision<fp32>} : vector<128x32xf32>, vector<16x32xf32>, vector<128x16xf32> -> vector<128x16xf32>
    %7 = vector.broadcast %5 : vector<128x1xf32> to vector<128x16xf32>
    %8 = vector.broadcast %2 : vector<1x16xf32> to vector<128x16xf32>
    %9 = arith.addf %7, %8 : vector<128x16xf32>
    %cst_6 = arith.constant 2.000000e+00 : f32
    %10 = vector.broadcast %cst_6 : f32 to vector<128x16xf32>
    %11 = arith.mulf %10, %6 : vector<128x16xf32>
    %12 = arith.subf %9, %11 : vector<128x16xf32>
    %c0_7 = arith.constant 0 : index
    %c0_8 = arith.constant 0 : index
    %13 = vector.load %arg4[%c0_7, %c0_8] : memref<128x16xf32, #tpu.memory_space<vmem>>, vector<128x16xf32>
    tpu.vector_store %arg4[%c0_7, %c0_8], %12 {strides = array<i32>} : memref<128x16xf32, #tpu.memory_space<vmem>>, vector<128x16xf32>,
    %14 = tpu.transpose %12, [1, 0] : vector<128x16xf32> -> vector<16x128xf32>
    %c0_9 = arith.constant 0 : index
    %c0_10 = arith.constant 0 : index
    %15 = vector.load %arg5[%c0_9, %c0_10] : memref<16x128xf32, #tpu.memory_space<vmem>>, vector<16x128xf32>
    tpu.vector_store %arg5[%c0_9, %c0_10], %14 {strides = array<i32>} : memref<16x128xf32, #tpu.memory_space<vmem>>, vector<16x128xf32>,
    return
  }
  func.func @transform_0(%arg0: i32) -> (i32, i32) {
    %c0_i32 = arith.constant 0 : i32
    %c0_i32_0 = arith.constant 0 : i32
    return %arg0, %c0_i32 : i32, i32
  }
  func.func @transform_1(%arg0: i32) -> (i32, i32) {
    %c0_i32 = arith.constant 0 : i32
    %c0_i32_0 = arith.constant 0 : i32
    %c0_i32_1 = arith.constant 0 : i32
    return %c0_i32, %c0_i32_0 : i32, i32
  }
  func.func @transform_2(%arg0: i32) -> (i32, i32) {
    %c0_i32 = arith.constant 0 : i32
    %c0_i32_0 = arith.constant 0 : i32
    %c0_i32_1 = arith.constant 0 : i32
    return %c0_i32, %c0_i32_0 : i32, i32
  }
  func.func @transform_3(%arg0: i32) -> (i32, i32) {
    %c0_i32 = arith.constant 0 : i32
    %c0_i32_0 = arith.constant 0 : i32
    return %arg0, %c0_i32 : i32, i32
  }
  func.func @transform_4(%arg0: i32) -> (i32, i32) {
    %c0_i32 = arith.constant 0 : i32
    %c0_i32_0 = arith.constant 0 : i32
    return %c0_i32, %arg0 : i32, i32
  }
}

</mosaic_0001>

<bundles_post_ra>
// kernel: tpu_custom_call.1
= control target key start
LH: loop header
LB: loop body
LE: loop exit
PB: predicated region body
PF: predicated region fallthrough
CT: control target
= control target key end

     0   :  { %vm52_vm0 = vcmask 261120   ;;  %s2426_s0 = inlined_call_operand.vmem [shape: f32[128,32], index: 0, kind: input, shape index: {}]   ;;  %s2427_s1 = inlined_call_operand.vmem [shape: f32[16,32], index: 1, kind: input, shape index: {}]   ;;  %s2428_s2 = inlined_call_operand.vmem [shape: f32[1,16], index: 2, kind: input, shape index: {}]   ;;  %s2429_s3 = inlined_call_operand.vmem [shape: f32[128,16], index: 3, kind: output, shape index: {0}]   ;;  %s2430_s4 = inlined_call_operand.hbm [shape: f32[16,128], index: 4, kind: output, shape index: {1}]  }
   0x1   :  { %v34_v0 = vld [vmem:[%s2427_s1 + $0x8] sm:$0xff]  ;;  %v33_v1 = vld [vmem:[%s2427_s1] sm:$0xff]  ;;  %v1734_v7 = vld [vmem:[%s2426_s0 + $0x10] sm:$0xff] }
   0x2   :  { %v17_v2 = vld [vmem:[%s2426_s0] sm:$0xff]  ;;  %v153_v3 = vsel %vm52_vm0, %v34_v0, 0  ;;  %v150_v4 = vsel %vm52_vm0, %v33_v1, 0  ;;  %v1729_v6 = vld [vmem:[%s2426_s0 + $0x8] sm:$0xff]  ;;  %v1739_v8 = vld [vmem:[%s2426_s0 + $0x18] sm:$0xff]  ;;  %v108_v17 = vsel %vm52_vm0, %v1734_v7, 0 }
   0x3   :  { %v102_v5 = vsel %vm52_vm0, %v17_v2, 0  ;;  %v1741_v9 = vmul.f32 %v17_v2, %v17_v2  ;;  %v1743_v10 = vand.u32 4294901760, %v153_v3  ;;  %v1745_v11 = vand.u32 4294901760, %v150_v4  ;;  %v1754_v14 = vld [vmem:[%s2426_s0 + $0x20] sm:$0xff]  ;;  %v1759_v15 = vld [vmem:[%s2426_s0 + $0x28] sm:$0xff] }
   0x4   :  { %v1747_v12 = vand.u32 4294901760, %v102_v5  ;;  %v105_v13 = vsel %vm52_vm0, %v1729_v6, 0  ;;  %v111_v18 = vsel %vm52_vm0, %v1739_v8, 0  ;;  %v114_v19 = vsel %vm52_vm0, %v1754_v14, 0 }
   0x5   :  { %v1761_v16 = vand.u32 4294901760, %v105_v13  ;;  %1493 = vmatprep.subr.mxu0 %v1743_v10  ;;  %v412_v21 = vsub.f32 %v153_v3, %v1743_v10  ;;  %v1774_v22 = vand.u32 4294901760, %v108_v17  ;;  %v1777_v23 = vsub.f32 %v150_v4, %v1745_v11 }
   0x6   :  { %v1771_v20 = vsub.f32 %v102_v5, %v1747_v12  ;;  %1525 = vmatprep.mubr.f32.mxu1 %v1747_v12  ;;  %1494 = vmatpush3.xpose.msra.mxu0 %v1743_v10  ;;  %v1784_v25 = vand.u32 4294901760, %v111_v18  ;;  %v1786_v26 = vand.u32 4294901760, %v114_v19  ;;  %v117_v27 = vsel %vm52_vm0, %v1759_v15, 0 }
   0x7   :  { %v1782_v24 = vsub.f32 %v105_v13, %v1761_v16  ;;  %1495 = vmatprep.subr.mxu0 %v1745_v11  ;;  %v1792_v29 = vand.u32 4294901760, %v412_v21  ;;  %v1795_v30 = vsub.f32 %v108_v17, %v1774_v22  ;;  %v1798_v31 = vand.u32 4294901760, %v1777_v23 }
   0x8   :  { %v2442_v28 = vand.u32 4294901760, %v1771_v20  ;;  %v1802_v33 = vsub.f32 %v111_v18, %v1784_v25  ;;  %v1805_v34 = vsub.f32 %v114_v19, %v1786_v26  ;;  %v1807_v35 = vand.u32 4294901760, %v117_v27 }
   0x9   :  { %v2441_v32 = vand.u32 4294901760, %v1782_v24 }
   0xa   :  { %10 = vsyncpa [#allocation3], 0  ;;  %v225_v36 = vsub.f32 %v1771_v20, %v2442_v28  ;;  %v414_v37 = vsub.f32 %v412_v21, %v1792_v29  ;;  %v2439_v38 = vand.u32 4294901760, %v1795_v30  ;;  %v421_v39 = vsub.f32 %v1777_v23, %v1798_v31  ;;  %1496 = vmatpush3.xpose.msra.mxu0 %v1745_v11  ;;  %v1828_v44 = vld [vmem:[%s2426_s0 + $0x30] sm:$0xff]  ;;  %v1833_v45 = vld [vmem:[%s2426_s0 + $0x38] sm:$0xff]  ;;  %s1686_s26 = smov [#allocation2]  }
   0xb   :  { %v235_v40 = vsub.f32 %v1782_v24, %v2441_v32  ;;  %v2438_v41 = vand.u32 4294901760, %v1802_v33  ;;  %v2437_v42 = vand.u32 4294901760, %v1805_v34  ;;  %v1823_v43 = vsub.f32 %v117_v27, %v1807_v35  ;;  %v1838_v46 = vld [vmem:[%s2426_s0 + $0x40] sm:$0xff]  ;;  %1549 = vmatprep.subr.mxu0 %v412_v21  ;;  %v1853_v55 = vld [vmem:[%s2426_s0 + $0x48] sm:$0xff]  ;;  %v1858_v56 = vld [vmem:[%s2426_s0 + $0x50] sm:$0xff]  ;;  %s1371_s27 = sshll.u32 %s1686_s26, 4  ;;  %s1372_s27 = int_to_ptr.vmem [resolvable:$true] %s1371_s27 }
   0xc   :  { %v226_v47 = vand.u32 4294901760, %v225_v36  ;;  %v415_v48 = vand.u32 4294901760, %v414_v37  ;;  %v245_v49 = vsub.f32 %v1795_v30, %v2439_v38  ;;  %v422_v50 = vand.u32 4294901760, %v421_v39  ;;  %v1874_v1 = vld [vmem:[%s2426_s0 + $0x58] sm:$0xff]  ;;  %v1879_v2 = vld [vmem:[%s2426_s0 + $0x60] sm:$0xff]  ;;  %v1899_v36 = vld [vmem:[%s2426_s0 + $0x68] sm:$0xff]  ;;  %p1669_p1 = scmp.lt.s32.totalorder %s1372_s27, %s1372_s27 }
   0xd   :  { %v236_v51 = vand.u32 4294901760, %v235_v40  ;;  %v255_v52 = vsub.f32 %v1802_v33, %v2438_v41  ;;  %v265_v53 = vsub.f32 %v1805_v34, %v2437_v42  ;;  %v2434_v54 = vand.u32 4294901760, %v1823_v43  ;;  %s1664_s28 = scalar_lea.vmem %s1372_s27, 256 }
   0xe   :  { %1497 = vmatprep.mubr.f32.mxu0 %v226_v47  ;;  %1521 = vmatprep.subr.mxu1 %v415_v48  ;;  %v246_v57 = vand.u32 4294901760, %v245_v49  ;;  %v120_v58 = vsel %vm52_vm0, %v1828_v44, 0  ;;  %v123_v59 = vsel %vm52_vm0, %v1833_v45, 0  ;;  %v126_v60 = vsel %vm52_vm0, %v1838_v46, 0  ;;  %p1665_p0 = scmp.ne.s32.totalorder %s1372_s27, %s1664_s28  ;;  %p1670_p2 = scmp.lt.s32.totalorder %s1664_s28, %s1664_s28 }
   0xf   :  { %1498 = vmatmul.mubr.f32.vlgmr.msra.gmra.mxu0 %v236_v51  ;;  %1522 = vmatpush3.xpose.msra.mxu1 %v415_v48  ;;  %v256_v61 = vand.u32 4294901760, %v255_v52  ;;  %v266_v62 = vand.u32 4294901760, %v265_v53  ;;  %v275_v63 = vsub.f32 %v1823_v43, %v2434_v54  ;;  %v1869_v0 = vand.u32 4294901760, %v120_v58 }
  0x10   :  { %1500 = vmatprep.mubr.f32.mxu0 %v246_v57  ;;  %1523 = vmatprep.subr.mxu1 %v422_v50  ;;  %v1881_v3 = vand.u32 4294901760, %v123_v59  ;;  %v1883_v4 = vand.u32 4294901760, %v126_v60  ;;  %v129_v5 = vsel %vm52_vm0, %v1853_v55, 0  ;;  %v132_v13 = vsel %vm52_vm0, %v1858_v56, 0  ;;  %p1671_p3 = por %p1670_p2, %p1669_p1 }
  0x11   :  { %1550 = vmatpush3.xpose.msra.mxu0 %v412_v21  ;;  %v276_v17 = vand.u32 4294901760, %v275_v63  ;;  %v1890_v18 = vsub.f32 %v120_v58, %v1869_v0  ;;  %v1892_v19 = vand.u32 4294901760, %v129_v5  ;;  %v1894_v27 = vand.u32 4294901760, %v132_v13 }
  0x12   :  { %v1902_v37 = vsub.f32 %v123_v59, %v1881_v3  ;;  %v1905_v39 = vsub.f32 %v126_v60, %v1883_v4  ;;  %v135_v21 = vsel %vm52_vm0, %v1874_v1, 0  ;;  %1551 = vmatprep.subr.mxu0 %v1777_v23  ;;  %v138_v40 = vsel %vm52_vm0, %v1879_v2, 0  ;;  %p1672_p4 = pnand %p1671_p3, %p1665_p0 }
  0x13   :  { %1501 = vmatmul.mubr.f32.gmra.mxu0 %v256_v61  ;;  %1524 = vmatpush3.xpose.msra.mxu1 %v422_v50  ;;  %v2433_v47 = vand.u32 4294901760, %v1890_v18  ;;  %v1914_v48 = vsub.f32 %v129_v5, %v1892_v19  ;;  %v1917_v49 = vsub.f32 %v132_v13, %v1894_v27  ;;  %v1919_v51 = vand.u32 4294901760, %v135_v21 }
  0x14   :  { %1503 = vmatprep.mubr.f32.mxu0 %v266_v62  ;;  %1577 = vmatprep.subr.mxu1 %v1743_v10  ;;  %v2432_v52 = vand.u32 4294901760, %v1902_v37  ;;  %v2431_v53 = vand.u32 4294901760, %v1905_v39  ;;  %v1924_v57 = vand.u32 4294901760, %v138_v40  ;;  %v141_v50 = vsel %vm52_vm0, %v1899_v36, 0 }
  0x15   :  { %v285_v58 = vsub.f32 %v1890_v18, %v2433_v47  ;;  %v2435_v59 = vand.u32 4294901760, %v1914_v48  ;;  %v2436_v60 = vand.u32 4294901760, %v1917_v49  ;;  %v1934_v61 = vsub.f32 %v135_v21, %v1919_v51  ;;  %1552 = vmatpush3.xpose.msra.mxu0 %v1777_v23  ;;  %v1952_v21 = vld [vmem:[%s2426_s0 + $0x70] sm:$0xff]  ;;  %v1966_v47 = vld [vmem:[%s2426_s0 + $0x78] sm:$0xff] }
  0x16   :  { %1526 = vmatmul.mubr.f32.vlgmr.msra.gmra.mxu1 %v1761_v16  ;;  %v295_v62 = vsub.f32 %v1902_v37, %v2432_v52  ;;  %v305_v63 = vsub.f32 %v1905_v39, %v2431_v53  ;;  %v1945_v5 = vsub.f32 %v138_v40, %v1924_v57  ;;  %v1947_v13 = vand.u32 4294901760, %v141_v50  ;;  %1605 = vmatprep.subr.mxu0 %v1792_v29 }
  0x17   :  { %1504 = vmatmul.mubr.f32.gmra.mxu0 %v276_v17  ;;  %1578 = vmatpush3.xpose.msra.mxu1 %v1743_v10  ;;  %v286_v23 = vand.u32 4294901760, %v285_v58  ;;  %v315_v53 = vsub.f32 %v1914_v48, %v2435_v59  ;;  %v325_v40 = vsub.f32 %v1917_v49, %v2436_v60  ;;  %v2440_v52 = vand.u32 4294901760, %v1934_v61 }
  0x18   :  { %1528 = vmatprep.mubr.f32.mxu1 %v1774_v22  ;;  %v296_v17 = vand.u32 4294901760, %v295_v62  ;;  %v306_v54 = vand.u32 4294901760, %v305_v63  ;;  %v344_v58 = vand.u32 4294901760, %v1945_v5  ;;  %1579 = vmatprep.subr.mxu1 %v1745_v11  ;;  %v1972_v59 = vsub.f32 %v141_v50, %v1947_v13 }
  0x19   :  { %1506 = vmatprep.mubr.f32.mxu0 %v286_v23  ;;  %v144_v60 = vsel %vm52_vm0, %v1952_v21, 0  ;;  %v316_v42 = vand.u32 4294901760, %v315_v53  ;;  %v335_v41 = vsub.f32 %v1934_v61, %v2440_v52  ;;  %v147_v63 = vsel %vm52_vm0, %v1966_v47, 0 }
  0x1a   :  { %1529 = vmatmul.mubr.f32.gmra.mxu1 %v1784_v25  ;;  %v1980_v62 = vand.u32 4294901760, %v144_v60  ;;  %v1986_v23 = vand.u32 4294901760, %v147_v63  ;;  %v53_v38 = vsel %vm52_vm0, %v1741_v9, 0.0  ;;  %v38_v53 = vmul.f32 %v1734_v7, %v1734_v7 }
  0x1b   :  { %1507 = vmatmul.mubr.f32.gmra.mxu0 %v296_v17  ;;  %1531 = vmatprep.mubr.f32.mxu1 %v1786_v26  ;;  %v326_v52 = vand.u32 4294901760, %v325_v40  ;;  %v345_v32 = vsub.f32 %v1945_v5, %v344_v58  ;;  %v37_v28 = vmul.f32 %v1729_v6, %v1729_v6  ;;  %v39_v9 = vmul.f32 %v1739_v8, %v1739_v8 }
  0x1c   :  { %1509 = vmatprep.mubr.f32.mxu0 %v306_v54  ;;  %1580 = vmatpush3.xpose.msra.mxu1 %v1745_v11  ;;  %v1997_v17 = vsub.f32 %v144_v60, %v1980_v62  ;;  %v2002_v50 = vsub.f32 %v147_v63, %v1986_v23  ;;  %v59_v7 = vsel %vm52_vm0, %v38_v53, 0.0  ;;  %v336_v54 = vand.u32 4294901760, %v335_v41 }
  0x1d   :  { %1633 = vmatprep.subr.mxu1 %v1743_v10  ;;  %54 = vadd.xlane.f32.xlu0 %v53_v38  ;;  %v56_v40 = vsel %vm52_vm0, %v37_v28, 0.0  ;;  %v40_v6 = vmul.f32 %v1754_v14, %v1754_v14  ;;  %v2443_v38 = vand.u32 4294901760, %v1972_v59  ;;  %v62_v53 = vsel %vm52_vm0, %v39_v9, 0.0 }
  0x1e   :  { %1532 = vmatmul.mubr.f32.gmra.mxu1 %v1807_v35  ;;  %v364_v60 = vand.u32 4294901760, %v1997_v17  ;;  %60 = vadd.xlane.f32.xlu1 %v59_v7  ;;  %v374_v8 = vand.u32 4294901760, %v2002_v50  ;;  %v41_v41 = vmul.f32 %v1759_v15, %v1759_v15  ;;  %v346_v7 = vand.u32 4294901760, %v345_v32 }
  0x1f   :  { %1510 = vmatmul.mubr.f32.gmra.mxu0 %v316_v42  ;;  %1534 = vmatprep.mubr.f32.mxu1 %v1869_v0  ;;  %v355_v63 = vsub.f32 %v1972_v59, %v2443_v38  ;;  %v65_v28 = vsel %vm52_vm0, %v40_v6, 0.0  ;;  %v42_v42 = vmul.f32 %v1828_v44, %v1828_v44  ;;  %vm1313_vm1 = vcmask 130048  }
  0x20   :  { %1512 = vmatprep.mubr.f32.mxu0 %v326_v52  ;;  %v365_v14 = vsub.f32 %v1997_v17, %v364_v60  ;;  %v375_v15 = vsub.f32 %v2002_v50, %v374_v8  ;;  %v68_v32 = vsel %vm52_vm0, %v41_v41, 0.0  ;;  %v43_v52 = vmul.f32 %v1833_v45, %v1833_v45 }
  0x21   :  { %57 = vadd.xlane.f32.xlu0 %v56_v40  ;;  %v356_v9 = vand.u32 4294901760, %v355_v63  ;;  %v71_v44 = vsel %vm52_vm0, %v42_v42, 0.0  ;;  %v45_v45 = vmul.f32 %v1853_v55, %v1853_v55  ;;  %v47_v41 = vmul.f32 %v1874_v1, %v1874_v1 }
  0x22   :  { %1535 = vmatmul.mubr.f32.gmra.mxu1 %v1881_v3  ;;  %63 = vadd.xlane.f32.xlu1 %v62_v53  ;;  %v366_v40 = vand.u32 4294901760, %v365_v14  ;;  %v376_v6 = vand.u32 4294901760, %v375_v15  ;;  %v74_v38 = vsel %vm52_vm0, %v43_v52, 0.0  ;;  %v46_v53 = vmul.f32 %v1858_v56, %v1858_v56 }
  0x23   :  { %1513 = vmatmul.mubr.f32.gmra.mxu0 %v336_v54  ;;  %1537 = vmatprep.mubr.f32.mxu1 %v1883_v4  ;;  %v44_v54 = vmul.f32 %v1838_v46, %v1838_v46  ;;  %v80_v46 = vsel %vm52_vm0, %v45_v45, 0.0  ;;  %v86_v56 = vsel %vm52_vm0, %v47_v41, 0.0  ;;  %v49_v1 = vmul.f32 %v1899_v36, %v1899_v36 }
  0x24   :  { %1515 = vmatprep.mubr.f32.mxu0 %v346_v7  ;;  %v83_v55 = vsel %vm52_vm0, %v46_v53, 0.0  ;;  %v48_v7 = vmul.f32 %v1879_v2, %v1879_v2  ;;  %v50_v14 = vmul.f32 %v1952_v21, %v1952_v21  ;;  %v2445_v42 = vand.u32 4294901760, %v1782_v24 }
  0x25   :  { %66 = vadd.xlane.f32.xlu0 %v65_v28  ;;  %v77_v63 = vsel %vm52_vm0, %v44_v54, 0.0  ;;  %v2444_v28 = vand.u32 4294901760, %v1771_v20  ;;  %v92_v36 = vsel %vm52_vm0, %v49_v1, 0.0 }
  0x26   :  { %1538 = vmatmul.mubr.f32.gmra.mxu1 %v1892_v19  ;;  %69 = vadd.xlane.f32.xlu1 %v68_v32  ;;  %v89_v2 = vsel %vm52_vm0, %v48_v7, 0.0  ;;  %v95_v21 = vsel %vm52_vm0, %v50_v14, 0.0 }
  0x27   :  { %1516 = vmatmul.mubr.f32.gmra.mxu0 %v356_v9  ;;  %1540 = vmatprep.mubr.f32.mxu1 %v1894_v27  ;;  %v2446_v9 = vand.u32 4294901760, %v1795_v30 }
  0x28   :  { %1518 = vmatprep.mubr.f32.mxu0 %v366_v40 }
  0x29   :  { %72 = vadd.xlane.f32.xlu0 %v71_v44 }
  0x2a   :  { %1541 = vmatmul.mubr.f32.gmra.mxu1 %v1919_v51  ;;  %75 = vadd.xlane.f32.xlu1 %v74_v38 }
  0x2b   :  { %1519 = vmatmul.mubr.f32.gmra.mxu0 %v376_v6  ;;  %1543 = vmatprep.mubr.f32.mxu1 %v1924_v57 }
  0x2c   :  { %1553 = vmatprep.mubr.f32.mxu0 %v1771_v20 }
  0x2d   :  { %78 = vadd.xlane.f32.xlu0 %v77_v63 }
  0x2e   :  { %1544 = vmatmul.mubr.f32.gmra.mxu1 %v1947_v13  ;;  %81 = vadd.xlane.f32.xlu1 %v80_v46 }
  0x2f   :  { %1554 = vmatmul.mubr.f32.vlgmr.msra.gmra.mxu0 %v1782_v24  ;;  %1546 = vmatprep.mubr.f32.mxu1 %v1980_v62  ;;  %v2447_v24 = vand.u32 4294901760, %v1802_v33 }
  0x30   :  { %1556 = vmatprep.mubr.f32.mxu0 %v1795_v30  ;;  %1606 = vmatpush3.xpose.msra.mxu0 %v1792_v29  ;;  %v51_v29 = vmul.f32 %v1966_v47, %v1966_v47  ;;  %v2450_v30 = vand.u32 4294901760, %v1890_v18 }
  0x31   :  { %1607 = vmatprep.subr.mxu0 %v1798_v31  ;;  %84 = vadd.xlane.f32.xlu0 %v83_v55 }
  0x32   :  { %1547 = vmatmul.mubr.f32.gmra.mxu1 %v1986_v23  ;;  %87 = vadd.xlane.f32.xlu1 %v86_v56  ;;  %v98_v20 = vsel %vm52_vm0, %v51_v29, 0.0 }
  0x33   :  { %1557 = vmatmul.mubr.f32.gmra.mxu0 %v1802_v33  ;;  %1581 = vmatprep.mubr.f32.mxu1 %v2444_v28  ;;  %v2451_v33 = vand.u32 4294901760, %v1902_v37 }
  0x34   :  { %1559 = vmatprep.mubr.f32.mxu0 %v1805_v34  ;;  %1608 = vmatpush3.xpose.msra.mxu0 %v1798_v31  ;;  %v2448_v31 = vand.u32 4294901760, %v1805_v34  ;;  %v2452_v34 = vand.u32 4294901760, %v1905_v39 }
  0x35   :  { %90 = vadd.xlane.f32.xlu0 %v89_v2 }
  0x36   :  { %1582 = vmatmul.mubr.f32.vlgmr.msra.gmra.mxu1 %v2445_v42  ;;  %93 = vadd.xlane.f32.xlu1 %v92_v36 }
  0x37   :  { %1560 = vmatmul.mubr.f32.gmra.mxu0 %v1823_v43  ;;  %1634 = vmatpush3.xpose.msra.mxu1 %v1743_v10  ;;  %v2449_v10 = vand.u32 4294901760, %v1823_v43  ;;  %v2454_v43 = vand.u32 4294901760, %v1917_v49 }
  0x38   :  { %1584 = vmatprep.mubr.f32.mxu1 %v2446_v9  ;;  %1562 = vmatprep.mubr.f32.mxu0 %v1890_v18  ;;  %v2455_v18 = vand.u32 4294901760, %v1934_v61 }
  0x39   :  { %1635 = vmatprep.subr.mxu1 %v1745_v11  ;;  %96 = vadd.xlane.f32.xlu0 %v95_v21 }
  0x3a   :  { %1585 = vmatmul.mubr.f32.gmra.mxu1 %v2447_v24  ;;  %99 = vadd.xlane.f32.xlu1 %v98_v20 }
  0x3b   :  { %1563 = vmatmul.mubr.f32.gmra.mxu0 %v1902_v37  ;;  %1587 = vmatprep.mubr.f32.mxu1 %v2448_v31  ;;  %v2456_v37 = vand.u32 4294901760, %v1972_v59 }
  0x3c   :  { %1565 = vmatprep.mubr.f32.mxu0 %v1905_v39  ;;  %1636 = vmatpush3.xpose.msra.mxu1 %v1745_v11  ;;  %v2453_v11 = vand.u32 4294901760, %v1914_v48 }
  0x3e   :  { %1588 = vmatmul.mubr.f32.gmra.mxu1 %v2449_v10 }
  0x3f   :  { %1566 = vmatmul.mubr.f32.gmra.mxu0 %v1914_v48  ;;  %1590 = vmatprep.mubr.f32.mxu1 %v2450_v30 }
  0x40   :  { %1568 = vmatprep.mubr.f32.mxu0 %v1917_v49 }
  0x42   :  { %1591 = vmatmul.mubr.f32.gmra.mxu1 %v2451_v33 }
  0x43   :  { %1569 = vmatmul.mubr.f32.gmra.mxu0 %v1934_v61  ;;  %1593 = vmatprep.mubr.f32.mxu1 %v2452_v34 }
  0x44   :  { %1571 = vmatprep.mubr.f32.mxu0 %v1945_v5 }
  0x46   :  { %1594 = vmatmul.mubr.f32.gmra.mxu1 %v2453_v11 }
  0x47   :  { %1572 = vmatmul.mubr.f32.gmra.mxu0 %v1972_v59  ;;  %1596 = vmatprep.mubr.f32.mxu1 %v2454_v43 }
  0x48   :  { %1574 = vmatprep.mubr.f32.mxu0 %v1997_v17 }
  0x4a   :  { %1597 = vmatmul.mubr.f32.gmra.mxu1 %v2455_v18 }
  0x4b   :  { %1575 = vmatmul.mubr.f32.gmra.mxu0 %v2002_v50  ;;  %1599 = vmatprep.mubr.f32.mxu1 %v344_v58 }
  0x4c   :  { %1609 = vmatprep.mubr.f32.mxu0 %v1747_v12 }
  0x4e   :  { %1600 = vmatmul.mubr.f32.gmra.mxu1 %v2456_v37 }
  0x4f   :  { %1610 = vmatmul.mubr.f32.vlgmr.msra.gmra.mxu0 %v1761_v16  ;;  %1602 = vmatprep.mubr.f32.mxu1 %v364_v60 }
  0x50   :  { %1612 = vmatprep.mubr.f32.mxu0 %v1774_v22 }
  0x52   :  { %1603 = vmatmul.mubr.f32.gmra.mxu1 %v374_v8 }
  0x53   :  { %1613 = vmatmul.mubr.f32.gmra.mxu0 %v1784_v25  ;;  %1637 = vmatprep.mubr.f32.mxu1 %v1747_v12 }
  0x54   :  { %1615 = vmatprep.mubr.f32.mxu0 %v1786_v26 }
  0x56   :  { %1638 = vmatmul.mubr.f32.vlgmr.msra.gmra.mxu1 %v1761_v16 }
  0x57   :  { %1616 = vmatmul.mubr.f32.gmra.mxu0 %v1807_v35  ;;  %1640 = vmatprep.mubr.f32.mxu1 %v1774_v22 }
  0x58   :  { %1618 = vmatprep.mubr.f32.mxu0 %v1869_v0 }
  0x5a   :  { %1641 = vmatmul.mubr.f32.gmra.mxu1 %v1784_v25 }
  0x5b   :  { %1619 = vmatmul.mubr.f32.gmra.mxu0 %v1881_v3  ;;  %1643 = vmatprep.mubr.f32.mxu1 %v1786_v26 }
  0x5c   :  { %1621 = vmatprep.mubr.f32.mxu0 %v1883_v4 }
  0x5e   :  { %1644 = vmatmul.mubr.f32.gmra.mxu1 %v1807_v35 }
  0x5f   :  { %1622 = vmatmul.mubr.f32.gmra.mxu0 %v1892_v19  ;;  %1646 = vmatprep.mubr.f32.mxu1 %v1869_v0 }
  0x60   :  { %1624 = vmatprep.mubr.f32.mxu0 %v1894_v27 }
  0x62   :  { %1647 = vmatmul.mubr.f32.gmra.mxu1 %v1881_v3 }
  0x63   :  { %1625 = vmatmul.mubr.f32.gmra.mxu0 %v1919_v51  ;;  %1649 = vmatprep.mubr.f32.mxu1 %v1883_v4 }
  0x64   :  { %1627 = vmatprep.mubr.f32.mxu0 %v1924_v57 }
  0x66   :  { %1650 = vmatmul.mubr.f32.gmra.mxu1 %v1892_v19 }
  0x67   :  { %1628 = vmatmul.mubr.f32.gmra.mxu0 %v1947_v13  ;;  %1652 = vmatprep.mubr.f32.mxu1 %v1894_v27 }
  0x68   :  { %1630 = vmatprep.mubr.f32.mxu0 %v1980_v62 }
  0x6a   :  { %1653 = vmatmul.mubr.f32.gmra.mxu1 %v1919_v51 }
  0x6b   :  { %1631 = vmatmul.mubr.f32.gmra.mxu0 %v1986_v23  ;;  %1655 = vmatprep.mubr.f32.mxu1 %v1924_v57 }
  0x6e   :  { %1656 = vmatmul.mubr.f32.gmra.mxu1 %v1947_v13 }
  0x6f   :  { %1658 = vmatprep.mubr.f32.mxu1 %v1980_v62 }
  0x72   :  { %1659 = vmatmul.mubr.f32.gmra.mxu1 %v1986_v23 }
  0xa6   :  { %v55_v30 = vpop.xlane.xlu0 %54 }
  0xa7   :  { %v2236_v20 = vpop.xlane.xlu1 %60 }
  0xab   :  { %v64_v11 = vpop.xlane.xlu1 %63 }
  0xcf   :  { %v2154_v12 = vpop.f32.mrf.mxu0 }
  0xd1   :  { %v2156_v16 = vpop.f32.mrf.mxu0 }
  0xd3   :  { %v2158_v22 = vpop.f32.mrf.mxu0 }
  0xd5   :  { %v2160_v25 = vpop.f32.mrf.mxu0 }
  0xd6   :  { %v1527_v26 = vpop.f32.mrf.mxu1 }
  0xd7   :  { %v2162_v35 = vpop.f32.mrf.mxu0 }
  0xd8   :  { %v459_v0 = vpop.f32.mrf.mxu1 }
  0xd9   :  { %v2164_v3 = vpop.f32.mrf.mxu0 }
  0xda   :  { %v2166_v4 = vpop.f32.mrf.mxu1 }
  0xdb   :  { %v2168_v19 = vpop.f32.mrf.mxu0 }
  0xdc   :  { %v2170_v27 = vpop.f32.mrf.mxu1 }
  0xdd   :  { %v2172_v39 = vpop.f32.mrf.mxu0 }
  0xde   :  { %v2174_v47 = vpop.f32.mrf.mxu1 }
  0xdf   :  { %v2176_v48 = vpop.f32.mrf.mxu0 }
  0xe0   :  { %v2178_v49 = vpop.f32.mrf.mxu1 }
  0xe1   :  { %v2180_v51 = vpop.f32.mrf.mxu0 }
  0xe2   :  { %v2182_v57 = vpop.f32.mrf.mxu1 }
  0xe3   :  { %v2184_v59 = vpop.f32.mrf.mxu0 }
  0xe4   :  { %v2186_v61 = vpop.f32.mrf.mxu1 }
  0xe5   :  { %v2188_v5 = vpop.f32.mrf.mxu0 }
  0xe6   :  { %v2190_v13 = vpop.f32.mrf.mxu1 }
  0xe7   :  { %v2192_v58 = vpop.f32.mrf.mxu0 }
  0xe8   :  { %2457 = vst [vmem:[#allocation5_spill] sm:$0xff] %v2192_v58  ;;  %v2194_v62 = vpop.f32.mrf.mxu1 }
  0xe9   :  { %v2196_v50 = vpop.f32.mrf.mxu0 }
  0xea   :  { %2458 = vst [vmem:[#allocation6_spill] sm:$0xff] %v2196_v50  ;;  %v2198_v23 = vpop.f32.mrf.mxu1  ;;  %v70_v50 = vpop.xlane.xlu1 %69 }
  0xeb   :  { %v2200_v17 = vpop.f32.mrf.mxu0 }
  0xec   :  { %2459 = vst [vmem:[#allocation7_spill] sm:$0xff] %v2200_v17  ;;  %v2202_v60 = vpop.f32.mrf.mxu1 }
  0xed   :  { %v2204_v8 = vpop.f32.mrf.mxu0 }
  0xee   :  { %2460 = vst [vmem:[#allocation8_spill] sm:$0xff] %v2204_v8  ;;  %v2206_v15 = vpop.f32.mrf.mxu1  ;;  %v76_v58 = vpop.xlane.xlu1 %75 }
  0xef   :  { %2461 = vst [vmem:[#allocation9_spill] sm:$0xff] %v2206_v15  ;;  %v1555_v32 = vpop.f32.mrf.mxu0 }
  0xf0   :  { %v2208_v52 = vpop.f32.mrf.mxu1 }
  0xf1   :  { %2462 = vst [vmem:[#allocation10_spill] sm:$0xff] %v2208_v52  ;;  %v625_v40 = vpop.f32.mrf.mxu0 }
  0xf2   :  { %v2210_v44 = vpop.f32.mrf.mxu1 }
  0xf3   :  { %2463 = vst [vmem:[#allocation11_spill] sm:$0xff] %v2210_v44  ;;  %v1558_v54 = vpop.f32.mrf.mxu0  ;;  %v58_v44 = vpop.xlane.xlu0 %57 }
  0xf4   :  { %v2212_v6 = vpop.f32.mrf.mxu1 }
  0xf5   :  { %2464 = vst [vmem:[#allocation12_spill] sm:$0xff] %v2212_v6  ;;  %v639_v38 = vpop.f32.mrf.mxu0  ;;  %v466_v6 = vadd.f32 %v1527_v26, %v2154_v12  ;;  %v2267_v12 = vld [vmem:[%s2428_s2] ss:$0 sm:$0xff] }
  0xf6   :  { %v1583_v45 = vpop.f32.mrf.mxu1 }
  0xf7   :  { %v1561_v63 = vpop.f32.mrf.mxu0  ;;  %v2269_v26 = vpop.xlane.xlu0 %66 }
  0xf8   :  { %v805_v53 = vpop.f32.mrf.mxu1 }
  0xf9   :  { %v2214_v46 = vpop.f32.mrf.mxu0 }
  0xfa   :  { %v1586_v41 = vpop.f32.mrf.mxu1 }
  0xfb   :  { %v2216_v55 = vpop.f32.mrf.mxu0 }
  0xfc   :  { %v821_v7 = vpop.f32.mrf.mxu1 }
  0xfd   :  { %v2218_v56 = vpop.f32.mrf.mxu0 }
  0xfe   :  { %v2220_v1 = vpop.f32.mrf.mxu1 }
  0xff   :  { %v2222_v2 = vpop.f32.mrf.mxu0 }
 0x100   :  { %v2224_v14 = vpop.f32.mrf.mxu1 }
 0x101   :  { %v2226_v28 = vpop.f32.mrf.mxu0 }
 0x102   :  { %v2228_v36 = vpop.f32.mrf.mxu1 }
 0x103   :  { %v2230_v29 = vpop.f32.mrf.mxu0 }
 0x104   :  { %v2232_v42 = vpop.f32.mrf.mxu1 }
 0x105   :  { %v2234_v21 = vpop.f32.mrf.mxu0 }
 0x106   :  { %2465 = vst [vmem:[#allocation13_spill] sm:$0xff] %v2234_v21  ;;  %v2238_v9 = vpop.f32.mrf.mxu1 }
 0x107   :  { %v2240_v24 = vpop.f32.mrf.mxu0 }
 0x108   :  { %2466 = vst [vmem:[#allocation14_spill] sm:$0xff] %v2240_v24  ;;  %v2242_v31 = vpop.f32.mrf.mxu1  ;;  %v633_v24 = vadd.f32 %v1555_v32, %v466_v6 }
 0x109   :  { %v2244_v10 = vpop.f32.mrf.mxu0 }
 0x10a   :  { %2467 = vst [vmem:[#allocation15_spill] sm:$0xff] %v2244_v10  ;;  %v2246_v33 = vpop.f32.mrf.mxu1  ;;  %v460_v10 = vadd.f32 %v459_v0, %v2156_v16  ;;  %v472_v16 = vadd.f32 %v2170_v27, %v2160_v25  ;;  %v1265_v27 = vadd.f32 %v2267_v12, %v55_v30 }
 0x10b   :  { %2468 = vst [vmem:[#allocation16_spill] sm:$0xff] %v2246_v33  ;;  %v2248_v34 = vpop.f32.mrf.mxu0 }
 0x10c   :  { %2469 = vst [vmem:[#allocation17_spill] sm:$0xff] %v2248_v34  ;;  %v2250_v43 = vpop.f32.mrf.mxu1  ;;  %v478_v34 = vadd.f32 %v2166_v4, %v2158_v22  ;;  %v490_v22 = vadd.f32 %v2174_v47, %v2162_v35 }
 0x10d   :  { %2470 = vst [vmem:[#allocation18_spill] sm:$0xff] %v2250_v43  ;;  %v2252_v18 = vpop.f32.mrf.mxu0  ;;  %v626_v43 = vadd.f32 %v625_v40, %v460_v10  ;;  %v1266_v40 = vadd.f32 %v2267_v12, %v58_v44  ;;  %v2281_v44 = vpop.xlane.xlu0 %72 }
 0x10e   :  { %2471 = vst [vmem:[#allocation19_spill] sm:$0xff] %v2252_v18  ;;  %v2254_v37 = vpop.f32.mrf.mxu1  ;;  %v814_v18 = vadd.f32 %v1583_v45, %v633_v24  ;;  %v647_v0 = vadd.f32 %v1558_v54, %v478_v34  ;;  %v640_v45 = vadd.f32 %v639_v38, %v472_v16  ;;  %v661_v25 = vadd.f32 %v1561_v63, %v490_v22 }
 0x10f   :  { %2472 = vst [vmem:[#allocation20_spill] sm:$0xff] %v2254_v37  ;;  %v1611_v8 = vpop.f32.mrf.mxu0  ;;  %v806_v32 = vadd.f32 %v805_v53, %v626_v43 }
 0x110   :  { %v2257_v17 = vpop.f32.mrf.mxu1  ;;  %v1009_v6 = vadd.f32 %v1611_v8, %v814_v18  ;;  %v830_v24 = vadd.f32 %v1586_v41, %v647_v0  ;;  %v822_v54 = vadd.f32 %v821_v7, %v640_v45  ;;  %v846_v41 = vadd.f32 %v2220_v1, %v661_v25  ;;  %v82_v0 = vpop.xlane.xlu1 %81 }
 0x111   :  { %2473 = vst [vmem:[#allocation21_spill] sm:$0xff] %v2257_v17  ;;  %v1002_v52 = vpop.f32.mrf.mxu0  ;;  %v496_v18 = vadd.f32 %v2186_v61, %v2172_v39  ;;  %v514_v39 = vadd.f32 %v2190_v13, %v2176_v48  ;;  %v79_v48 = vpop.xlane.xlu0 %78  ;;  %v508_v13 = vadd.f32 %v2194_v62, %v2180_v51  ;;  %v526_v51 = vadd.f32 %v2198_v23, %v2184_v59 }
 0x112   :  { %v2260_v33 = vpop.f32.mrf.mxu1  ;;  %v1003_v10 = vadd.f32 %v1002_v52, %v806_v32  ;;  %v502_v52 = vadd.f32 %v2182_v57, %v2168_v19  ;;  %v1267_v19 = vadd.f32 %v2267_v12, %v2236_v20  ;;  %v520_v23 = vadd.f32 %v2202_v60, %v2188_v5  ;;  %v2476_v60 = vld [vmem:[#allocation5_spill] sm:$0xff] }
 0x113   :  { %2474 = vst [vmem:[#allocation22_spill] sm:$0xff] %v2260_v33  ;;  %v1614_v21 = vpop.f32.mrf.mxu0  ;;  %v668_v61 = vadd.f32 %v2218_v56, %v496_v18  ;;  %v689_v56 = vadd.f32 %v2222_v2, %v514_v39  ;;  %v682_v62 = vadd.f32 %v2226_v28, %v508_v13  ;;  %v703_v28 = vadd.f32 %v2230_v29, %v526_v51  ;;  %v2477_v29 = vld [vmem:[#allocation9_spill] sm:$0xff]  ;;  %v2484_v13 = vld [vmem:[#allocation7_spill] sm:$0xff] }
 0x114   :  { %v2271_v17 = vpop.f32.mrf.mxu1  ;;  %v1021_v53 = vadd.f32 %v1614_v21, %v830_v24  ;;  %v88_v59 = vpop.xlane.xlu1 %87  ;;  %v2483_v39 = vld [vmem:[#allocation18_spill] sm:$0xff] }
 0x115   :  { %2475 = vst [vmem:[#allocation23_spill] sm:$0xff] %v2271_v17  ;;  %v1014_v33 = vpop.f32.mrf.mxu0  ;;  %v484_v17 = vadd.f32 %v2178_v49, %v2164_v3  ;;  %v1268_v49 = vadd.f32 %v2267_v12, %v64_v11  ;;  %v878_v2 = vadd.f32 %v2238_v9, %v689_v56  ;;  %v85_v5 = vpop.xlane.xlu0 %84  ;;  %v2485_v56 = vld [vmem:[#allocation11_spill] sm:$0xff] }
 0x116   :  { %v1639_v4 = vpop.f32.mrf.mxu1  ;;  %v1015_v63 = vadd.f32 %v1014_v33, %v822_v54 }
 0x117   :  { %v1172_v37 = vadd.f32 %v1639_v4, %v1009_v6  ;;  %v1617_v15 = vpop.f32.mrf.mxu0  ;;  %v654_v38 = vadd.f32 %v2214_v46, %v484_v17 }
 0x118   :  { %v1165_v8 = vpop.f32.mrf.mxu1  ;;  %v1033_v17 = vadd.f32 %v1617_v15, %v846_v41  ;;  %v1270_v15 = vadd.f32 %v2267_v12, %v70_v50  ;;  %v854_v50 = vadd.f32 %v2232_v42, %v668_v61 }
 0x119   :  { %v1282_v35 = vmul.f32 2.0, %v1172_v37  ;;  %v1166_v47 = vadd.f32 %v1165_v8, %v1003_v10  ;;  %v1026_v34 = vpop.f32.mrf.mxu0  ;;  %v675_v37 = vadd.f32 %v2216_v55, %v502_v52  ;;  %v838_v16 = vadd.f32 %v2224_v14, %v654_v38 }
 0x11a   :  { %v1642_v3 = vpop.f32.mrf.mxu1 }
 0x11b   :  { %v1281_v30 = vmul.f32 2.0, %v1166_v47  ;;  %v1298_v43 = vsub.f32 %v1266_v40, %v1282_v35  ;;  %v1184_v7 = vadd.f32 %v1642_v3, %v1021_v53  ;;  %v1620_v21 = vpop.f32.mrf.mxu0  ;;  %v862_v55 = vadd.f32 %v2228_v36, %v675_v37 }
 0x11c   :  { %v1177_v57 = vpop.f32.mrf.mxu1  ;;  %v1027_v20 = vadd.f32 %v1026_v34, %v838_v16  ;;  %v1269_v40 = vadd.f32 %v2267_v12, %v2269_v26  ;;  %v1272_v26 = vadd.f32 %v2267_v12, %v76_v58  ;;  %v870_v58 = vadd.f32 %v2242_v31, %v682_v62  ;;  %v2478_v31 = vld [vmem:[#allocation13_spill] sm:$0xff] }
 0x11d   :  { %1315 = vst.msk [vmem:[%s2429_s3 + $0x8] sm:$0xff] %vm1313_vm1, %v1298_v43  ;;  %v1284_v46 = vmul.f32 2.0, %v1184_v7  ;;  %v1178_v1 = vadd.f32 %v1177_v57, %v1015_v63  ;;  %v1038_v33 = vpop.f32.mrf.mxu0  ;;  %v1297_v11 = vsub.f32 %v1265_v27, %v1281_v30  ;;  %v1045_v45 = vadd.f32 %v1620_v21, %v862_v55 }
 0x11e   :  { %v1645_v14 = vpop.f32.mrf.mxu1  ;;  %v1039_v8 = vadd.f32 %v1038_v33, %v854_v50  ;;  %v1271_v34 = vadd.f32 %v2267_v12, %v2281_v44  ;;  %v538_v63 = vadd.f32 %v2477_v29, %v2476_v60  ;;  %v696_v30 = vadd.f32 %v2478_v31, %v520_v23  ;;  %v2482_v33 = vld [vmem:[#allocation14_spill] sm:$0xff] }
 0x11f   :  { %v2303_v32 = vsub.f32 %v1268_v49, %v1284_v46  ;;  %v1283_v6 = vmul.f32 2.0, %v1178_v1  ;;  %v1196_v22 = vadd.f32 %v1645_v14, %v1033_v17  ;;  %v1623_v4 = vpop.f32.mrf.mxu0  ;;  %1330 = vxpose.xlu0.b32.start [1/16] (narrow) %v1297_v11, 16  ;;  %1314 = vst.msk [vmem:[%s2429_s3] sm:$0xff] %vm1313_vm1, %v1297_v11  ;;  %v1274_v21 = vadd.f32 %v2267_v12, %v82_v0  ;;  %v2480_v17 = vld [vmem:[#allocation6_spill] sm:$0xff] }
 0x120   :  { %v1189_v36 = vpop.f32.mrf.mxu1  ;;  %v1057_v52 = vadd.f32 %v1623_v4, %v878_v2  ;;  %v2481_v46 = vld [vmem:[#allocation10_spill] sm:$0xff]  ;;  %v717_v11 = vadd.f32 %v2482_v33, %v538_v63  ;;  %v886_v61 = vadd.f32 %v2483_v39, %v696_v30  ;;  %v1273_v55 = vadd.f32 %v2267_v12, %v79_v48  ;;  %v94_v4 = vpop.xlane.xlu1 %93 }
 0x121   :  { %1317 = vst.msk [vmem:[%s2429_s3 + $0x18] sm:$0xff] %vm1313_vm1, %v2303_v32  ;;  %v1299_v24 = vsub.f32 %v1267_v19, %v1283_v6  ;;  %v1286_v10 = vmul.f32 2.0, %v1196_v22  ;;  %v1190_v25 = vadd.f32 %v1189_v36, %v1027_v20  ;;  %v1050_v27 = vpop.f32.mrf.mxu0  ;;  %v532_v1 = vadd.f32 %v2481_v46, %v2480_v17  ;;  %v2486_v36 = vld [vmem:[#allocation15_spill] sm:$0xff]  ;;  %v91_v2 = vpop.xlane.xlu0 %90 }
 0x122   :  { %v1648_v42 = vpop.f32.mrf.mxu1  ;;  %v1051_v18 = vadd.f32 %v1050_v27, %v870_v58  ;;  %v550_v50 = vadd.f32 %v2485_v56, %v2484_v13  ;;  %v1275_v58 = vadd.f32 %v2267_v12, %v85_v5  ;;  %v1278_v63 = vadd.f32 %v2267_v12, %v94_v4 }
 0x123   :  { %1316 = vst.msk [vmem:[%s2429_s3 + $0x10] sm:$0xff] %vm1313_vm1, %v1299_v24  ;;  %v2329_v54 = vsub.f32 %v1270_v15, %v1286_v10  ;;  %v1285_v53 = vmul.f32 2.0, %v1190_v25  ;;  %v1208_v35 = vadd.f32 %v1648_v42, %v1045_v45  ;;  %v1626_v47 = vpop.f32.mrf.mxu0  ;;  %1331 = vxpose.xlu0.b32.cont [2/16] (narrow) %v1298_v43, 16  ;;  %v2479_v43 = vld [vmem:[#allocation16_spill] sm:$0xff]  ;;  %v1276_v10 = vadd.f32 %v2267_v12, %v88_v59 }
 0x124   :  { %v1201_v9 = vpop.f32.mrf.mxu1  ;;  %v894_v7 = vadd.f32 %v2479_v43, %v703_v28  ;;  %v2487_v45 = vld [vmem:[#allocation20_spill] sm:$0xff] }
 0x125   :  { %1319 = vst.msk [vmem:[%s2429_s3 + $0x28] sm:$0xff] %vm1313_vm1, %v2329_v54  ;;  %v1288_v38 = vmul.f32 2.0, %v1208_v35  ;;  %v1301_v41 = vsub.f32 %v1269_v40, %v1285_v53  ;;  %v1202_v3 = vadd.f32 %v1201_v9, %v1039_v8  ;;  %v1062_v49 = vpop.f32.mrf.mxu0  ;;  %v710_v40 = vadd.f32 %v2486_v36, %v532_v1  ;;  %v2488_v42 = vld [vmem:[#allocation8_spill] sm:$0xff]  ;;  %v2490_v53 = vld [vmem:[#allocation17_spill] sm:$0xff] }
 0x126   :  { %v1651_v44 = vpop.f32.mrf.mxu1  ;;  %v1069_v14 = vadd.f32 %v1626_v47, %v894_v7  ;;  %v910_v48 = vadd.f32 %v2487_v45, %v717_v11  ;;  %v1063_v25 = vadd.f32 %v1062_v49, %v886_v61  ;;  %v731_v35 = vadd.f32 %v2490_v53, %v550_v50  ;;  %v2491_v47 = vld [vmem:[#allocation21_spill] sm:$0xff]  ;;  %v2493_v49 = vld [vmem:[#allocation22_spill] sm:$0xff]  ;;  %v100_v7 = vpop.xlane.xlu1 %99 }
 0x127   :  { %1318 = vst.msk [vmem:[%s2429_s3 + $0x20] sm:$0xff] %vm1313_vm1, %v1301_v41  ;;  %v2351_v37 = vsub.f32 %v1272_v26, %v1288_v38  ;;  %v1287_v16 = vmul.f32 2.0, %v1202_v3  ;;  %v1220_v19 = vadd.f32 %v1651_v44, %v1057_v52  ;;  %v1629_v57 = vpop.f32.mrf.mxu0  ;;  %1332 = vxpose.xlu0.b32.cont [3/16] (narrow) %v1299_v24, 16  ;;  %v2489_v26 = vld [vmem:[#allocation12_spill] sm:$0xff]  ;;  %v902_v59 = vadd.f32 %v2491_v47, %v710_v40  ;;  %v2492_v38 = vld [vmem:[#allocation19_spill] sm:$0xff] }
 0x128   :  { %v1213_v0 = vpop.f32.mrf.mxu1  ;;  %v544_v8 = vadd.f32 %v2489_v26, %v2488_v42  ;;  %v1081_v9 = vadd.f32 %v1629_v57, %v910_v48  ;;  %v926_v60 = vadd.f32 %v2493_v49, %v731_v35  ;;  %v2494_v44 = vld [vmem:[#allocation23_spill] sm:$0xff]  ;;  %v1280_v11 = vadd.f32 %v2267_v12, %v100_v7 }
 0x129   :  { %1321 = vst.msk [vmem:[%s2429_s3 + $0x38] sm:$0xff] %vm1313_vm1, %v2351_v37  ;;  %v1290_v15 = vmul.f32 2.0, %v1220_v19  ;;  %v2363_v20 = vsub.f32 %v1271_v34, %v1287_v16  ;;  %v1214_v6 = vadd.f32 %v1213_v0, %v1051_v18  ;;  %v1074_v22 = vpop.f32.mrf.mxu0  ;;  %v1277_v19 = vadd.f32 %v2267_v12, %v91_v2 }
 0x12a   :  { %v1654_v24 = vpop.f32.mrf.mxu1  ;;  %v724_v3 = vadd.f32 %v2492_v38, %v544_v8  ;;  %v1075_v31 = vadd.f32 %v1074_v22, %v902_v59 }
 0x12b   :  { %1320 = vst.msk [vmem:[%s2429_s3 + $0x30] sm:$0xff] %vm1313_vm1, %v2363_v20  ;;  %v1306_v27 = vsub.f32 %v1274_v21, %v1290_v15  ;;  %v1289_v51 = vmul.f32 2.0, %v1214_v6  ;;  %v1232_v62 = vadd.f32 %v1654_v24, %v1069_v14  ;;  %1333 = vxpose.xlu0.b32.cont [4/16] (narrow) %v2303_v32, 16  ;;  %v1632_v23 = vpop.f32.mrf.mxu0 }
 0x12c   :  { %v1225_v28 = vpop.f32.mrf.mxu1  ;;  %v918_v21 = vadd.f32 %v2494_v44, %v724_v3  ;;  %v1093_v57 = vadd.f32 %v1632_v23, %v926_v60 }
 0x12d   :  { %1323 = vst.msk [vmem:[%s2429_s3 + $0x48] sm:$0xff] %vm1313_vm1, %v1306_v27  ;;  %v1292_v34 = vmul.f32 2.0, %v1232_v62  ;;  %v1305_v32 = vsub.f32 %v1273_v55, %v1289_v51  ;;  %v1226_v52 = vadd.f32 %v1225_v28, %v1063_v25  ;;  %v1086_v18 = vpop.f32.mrf.mxu0 }
 0x12e   :  { %v1657_v29 = vpop.f32.mrf.mxu1  ;;  %v1087_v39 = vadd.f32 %v1086_v18, %v918_v21 }
 0x12f   :  { %1322 = vst.msk [vmem:[%s2429_s3 + $0x40] sm:$0xff] %vm1313_vm1, %v1305_v32  ;;  %v1308_v5 = vsub.f32 %v1276_v10, %v1292_v34  ;;  %v1291_v30 = vmul.f32 2.0, %v1226_v52  ;;  %v1244_v43 = vadd.f32 %v1657_v29, %v1081_v9  ;;  %1334 = vxpose.xlu0.b32.cont [5/16] (narrow) %v1301_v41, 16  ;;  %v97_v41 = vpop.xlane.xlu0 %96 }
 0x130   :  { %v1237_v16 = vpop.f32.mrf.mxu1  ;;  %v1279_v4 = vadd.f32 %v2267_v12, %v97_v41 }
 0x131   :  { %1325 = vst.msk [vmem:[%s2429_s3 + $0x58] sm:$0xff] %vm1313_vm1, %v1308_v5  ;;  %v1294_v17 = vmul.f32 2.0, %v1244_v43  ;;  %v1307_v46 = vsub.f32 %v1275_v58, %v1291_v30  ;;  %v1238_v1 = vadd.f32 %v1237_v16, %v1075_v31 }
 0x132   :  { %v1660_v33 = vpop.f32.mrf.mxu1 }
 0x133   :  { %1324 = vst.msk [vmem:[%s2429_s3 + $0x50] sm:$0xff] %vm1313_vm1, %v1307_v46  ;;  %v1310_v61 = vsub.f32 %v1278_v63, %v1294_v17  ;;  %v1293_v0 = vmul.f32 2.0, %v1238_v1  ;;  %v1256_v55 = vadd.f32 %v1660_v33, %v1093_v57  ;;  %1335 = vxpose.xlu0.b32.cont [6/16] (narrow) %v2329_v54, 16 }
 0x134   :  { %v1249_v14 = vpop.f32.mrf.mxu1 }
 0x135   :  { %1327 = vst.msk [vmem:[%s2429_s3 + $0x68] sm:$0xff] %vm1313_vm1, %v1310_v61  ;;  %v1296_v15 = vmul.f32 2.0, %v1256_v55  ;;  %v1309_v6 = vsub.f32 %v1277_v19, %v1293_v0  ;;  %v1250_v22 = vadd.f32 %v1249_v14, %v1087_v39 }
 0x137   :  { %1326 = vst.msk [vmem:[%s2429_s3 + $0x60] sm:$0xff] %vm1313_vm1, %v1309_v6  ;;  %v1312_v13 = vsub.f32 %v1280_v11, %v1296_v15  ;;  %v1295_v56 = vmul.f32 2.0, %v1250_v22  ;;  %1336 = vxpose.xlu0.b32.cont [7/16] (narrow) %v2363_v20, 16 }
 0x139   :  { %1329 = vst.msk [vmem:[%s2429_s3 + $0x78] sm:$0xff] %vm1313_vm1, %v1312_v13  ;;  %v1311_v54 = vsub.f32 %v1279_v4, %v1295_v56 }
 0x13b   :  { %1328 = vst.msk [vmem:[%s2429_s3 + $0x70] sm:$0xff] %vm1313_vm1, %v1311_v54  ;;  %1337 = vxpose.xlu0.b32.cont [8/16] (narrow) %v2351_v37, 16 }
 0x13f   :  { %1338 = vxpose.xlu0.b32.cont [9/16] (narrow) %v1305_v32, 16 }
 0x143   :  { %1339 = vxpose.xlu0.b32.cont [10/16] (narrow) %v1306_v27, 16 }
 0x147   :  { %1340 = vxpose.xlu0.b32.cont [11/16] (narrow) %v1307_v46, 16 }
 0x14b   :  { %1341 = vxpose.xlu0.b32.cont [12/16] (narrow) %v1308_v5, 16 }
 0x14f   :  { %1342 = vxpose.xlu0.b32.cont [13/16] (narrow) %v1309_v6, 16 }
 0x153   :  { %1343 = vxpose.xlu0.b32.cont [14/16] (narrow) %v1310_v61, 16 }
 0x157   :  { %1344 = vxpose.xlu0.b32.cont [15/16] (narrow) %v1311_v54, 16 }
 0x15b   :  { %1345 = vxpose.xlu0.b32.end [16/16] (narrow) %v1312_v13, 16 }
 0x19b   :  { %v1346_v12 = vpop.trf.xlu0 }
 0x19c   :  { %1362 = vst [vmem:[#allocation2] sm:$0xff] %v1346_v12 }
 0x19f   :  { %v1347_v20 = vpop.trf.xlu0 }
 0x1a0   :  { %1363 = vst [vmem:[#allocation2 + $0x8] sm:$0xff] %v1347_v20 }
 0x1a1   :  { %1675 = shalt.err (!%p1672_p4)
}
 0x1a2   :  { %s1687_s3 = smov 128   ;;  %s1688_s29 = smov 8  }
 0x1a3   :  { %1377 = dma.vmem_to_hbm [thread:$0]  %s1372_s27, 256, %s2430_s4, [#allocation3], %s1687_s3, %s1687_s3, %s1688_s29  }
 0x1a4   :  { %1684 = dma.done.wait [#allocation3], 256  }
 0x1a5   :  { %1685 = vsyncadd [#allocation3], 4294967040 }
 0x1a6   :  { %1383 = vsyncpa [#allocation3], 1 }

</bundles_post_ra>
